<compile_context>
chip_gen: v5e
topology: v5e:2x2
jax: 0.10.0
libtpu: 0.0.40
codegen_flags: <defaults>
</compile_context>

<pallas_src>
import functools
import math

import jax
import jax.numpy as jnp
from jax.experimental import pallas as pl
from jax.experimental.pallas import tpu as pltpu

PAD_IDX = 2  # stand-in for Field.cls_idx


def _round_up(x, m):
    return ((x + m - 1) // m) * m


def _membed_kernel(ids_ref, lut_hbm, w_ref, sent_ref, out_ref, emb_buf, sem,
                   *, tokens_per_tile):
    # ids_ref:  (N_pad,)        int32  SMEM (scalar prefetch)   flattened token ids
    # lut_hbm:  (V, Dp)         f32    HBM (pl.ANY)             embedding table
    # w_ref:    (Dp, Dp)        f32    VMEM                     scaler * W[:, D:].T (padded)
    # sent_ref: (TM, Dp)        f32    VMEM                     per-token sent term (+bias)
    # out_ref:  (TM, Dp)        f32    VMEM                     merged output tile
    # emb_buf:  (TM, Dp)        f32    VMEM scratch             gathered embedding rows
    # sem:      DMA semaphore
    base = pl.program_id(0) * tokens_per_tile

    # Issue one row DMA per token in this tile (gather from the HBM LUT).
    @pl.loop(0, tokens_per_tile)
    def _issue(i):
        tok = ids_ref[base + i]
        pltpu.make_async_copy(
            lut_hbm.at[pl.ds(tok, 1), :],
            emb_buf.at[pl.ds(i, 1), :],
            sem,
        ).start()

    # Drain: every copy has identical shape, so waiting `tokens_per_tile`
    # times with a same-shaped descriptor consumes all completions.
    @pl.loop(0, tokens_per_tile)
    def _drain(i):
        pltpu.make_async_copy(
            lut_hbm.at[pl.ds(0, 1), :],
            emb_buf.at[pl.ds(0, 1), :],
            sem,
        ).wait()

    # merged = embs @ (scaler * W[:, D:].T)  +  ((sent*scaler) @ W[:, :D].T + b)
    acc = jnp.dot(emb_buf[...], w_ref[...], preferred_element_type=jnp.float32)
    out_ref[...] = (acc + sent_ref[...].astype(jnp.float32)).astype(out_ref.dtype)


def membeddings_forward(word_ids, sent_repr, lut, weight, bias, *,
                        tokens_per_tile=256, compute_dtype=jnp.float32):
    """word_ids (B, L) int; sent_repr (B, D); lut (V, D);
    weight (D, 2D) PyTorch nn.Linear layout; bias (D,). Returns (B, L, D) f32.

    compute_dtype=jnp.bfloat16 halves LUT/weight footprint & HBM traffic and
    uses the bf16 MXU path on v6e/v7x (accumulation stays f32)."""
    batch, max_len = word_ids.shape
    vocab, d_model = lut.shape
    scaler = math.sqrt(d_model)

    # ---- hoisted preprocessing (plain XLA, done once per call) ----------------
    w_t = weight.T.astype(jnp.float32)                                  # (2D, D)
    # sent half of the Linear + bias + scaler, one (B,D)@(D,D) matmul:
    sent_term = (sent_repr.astype(jnp.float32) * scaler) @ w_t[:d_model] + bias
    # embedding half of the Linear with the scaler folded in:
    w_emb = w_t[d_model:] * scaler                                      # (D, D)

    dp = _round_up(d_model, 128)              # lane-dense last dim inside kernel
    n_tok = batch * max_len
    tm = min(tokens_per_tile, _round_up(n_tok, 8))
    n_pad = _round_up(n_tok, tm)

    # Flattened, clamped, padded token ids (scalar-prefetch operand).
    ids = jnp.clip(word_ids.reshape(-1).astype(jnp.int32), 0, vocab - 1)
    ids = jnp.pad(ids, (0, n_pad - n_tok))    # padded slots gather row 0, discarded

    lut_p = jnp.pad(lut.astype(compute_dtype), ((0, 0), (0, dp - d_model)))
    w_p = jnp.zeros((dp, dp), dtype=compute_dtype)
    w_p = w_p.at[:d_model, :d_model].set(w_emb.astype(compute_dtype))

    sent_tok = jnp.broadcast_to(sent_term[:, None, :],
                                (batch, max_len, d_model)).reshape(n_tok, d_model)
    sent_tok = jnp.pad(sent_tok.astype(jnp.float32),
                       ((0, n_pad - n_tok), (0, dp - d_model)))

    kernel = functools.partial(_membed_kernel, tokens_per_tile=tm)

    out = pl.pallas_call(
        kernel,
        out_shape=jax.ShapeDtypeStruct((n_pad, dp), jnp.float32),
        grid_spec=pltpu.PrefetchScalarGridSpec(
            num_scalar_prefetch=1,
            grid=(n_pad // tm,),
            in_specs=[
                pl.BlockSpec(memory_space=pl.ANY),                     # lut (HBM)
                pl.BlockSpec((dp, dp), lambda t, ids: (0, 0)),         # w_emb
                pl.BlockSpec((tm, dp), lambda t, ids: (t, 0)),         # sent_term
            ],
            out_specs=pl.BlockSpec((tm, dp), lambda t, ids: (t, 0)),
            scratch_shapes=[
                pltpu.VMEM((tm, dp), compute_dtype),                   # gathered rows
                pltpu.SemaphoreType.DMA,                               # gather sem
            ],
        ),
        compiler_params=pltpu.CompilerParams(
            dimension_semantics=("parallel",)),
    )(ids, lut_p, w_p, sent_tok)

    return out[:n_tok, :d_model].reshape(batch, max_len, d_model)


if __name__ == "__main__":
    # Small shapes consistent with the module's forward.
    batch, max_len, d_model, vocab = 2, 8, 32, 64

    key = jax.random.PRNGKey(0)
    k_ids, k_sent, k_lut, k_w, k_b = jax.random.split(key, 5)

    word_ids = jax.random.randint(k_ids, (batch, max_len), 0, vocab, dtype=jnp.int32)
    sent_repr = jax.random.normal(k_sent, (batch, d_model), dtype=jnp.float32)

    # nn.Embedding(vocab, d_model, padding_idx=PAD_IDX): normal init, pad row zeroed.
    lut = jax.random.normal(k_lut, (vocab, d_model), dtype=jnp.float32)
    lut = lut.at[PAD_IDX].set(0.0)

    # nn.Linear(2*d_model, d_model): uniform(-1/sqrt(fan_in), 1/sqrt(fan_in)).
    bound = 1.0 / math.sqrt(2 * d_model)
    weight = jax.random.uniform(k_w, (d_model, 2 * d_model),
                                minval=-bound, maxval=bound, dtype=jnp.float32)
    bias = jax.random.uniform(k_b, (d_model,),
                              minval=-bound, maxval=bound, dtype=jnp.float32)

    out = membeddings_forward(word_ids, sent_repr, lut, weight, bias)
    out = jax.block_until_ready(out)

    # Pure-JAX reference of the PyTorch forward.
    scaler = math.sqrt(d_model)
    embs_ref = lut[word_ids] * scaler                               # (B, L, D)
    sent_exp = jnp.broadcast_to((sent_repr * scaler)[:, None, :], embs_ref.shape)
    concat_ref = jnp.concatenate([sent_exp, embs_ref], axis=-1)     # (B, L, 2D)
    ref = concat_ref @ weight.T + bias                              # (B, L, D)

    assert out.shape == (batch, max_len, d_model)
    assert jnp.allclose(out, ref, rtol=1e-5, atol=1e-4), (
        f"max abs err = {jnp.max(jnp.abs(out - ref))}")

    print("KERNEL_OK")
</pallas_src>

<mosaic_0001>
module attributes {stable_mosaic.version = 11 : i64} {
  func.func @_membed_kernel(%arg0: i32, %arg1: memref<16xi32, #tpu.memory_space<smem>>, %arg2: memref<64x128xf32, #tpu.memory_space<any>>, %arg3: memref<128x128xf32, #tpu.memory_space<vmem>>, %arg4: memref<16x128xf32, #tpu.memory_space<vmem>>, %arg5: memref<16x128xf32, #tpu.memory_space<vmem>>, %arg6: memref<16x128xf32, #tpu.memory_space<vmem>>, %arg7: memref<!tpu.dma_semaphore, #tpu.memory_space<semaphore_mem>>) attributes {dimension_semantics = [#tpu.dimension_semantics<parallel>], iteration_bounds = array<i64: 1>, scalar_prefetch = 1 : i64, scratch_operands = 2 : i64, tpu.core_type = #tpu.core_type<tc>, window_params = [{}, {pipeline_mode = #tpu.pipeline_mode<synchronous>, transform_indices = @transform_1, window_bounds = array<i64: 128, 128>}, {transform_indices = @transform_2, window_bounds = array<i64: 16, 128>}, {transform_indices = @transform_3, window_bounds = array<i64: 16, 128>}]} {
    %c16_i32 = arith.constant 16 : i32
    %0 = arith.muli %arg0, %c16_i32 : i32
    %c0_i32 = arith.constant 0 : i32
    %c16_i32_0 = arith.constant 16 : i32
    %1 = arith.addi %c0_i32, %c16_i32_0 : i32
    %c1_i32 = arith.constant 1 : i32
    scf.for %arg8 = %c0_i32 to %1 step %c1_i32  : i32 {
      %c1_i32_12 = arith.constant 1 : i32
      %9 = arith.muli %arg8, %c1_i32_12 : i32
      %c0_i32_13 = arith.constant 0 : i32
      %10 = arith.addi %c0_i32_13, %9 : i32
      %11 = arith.addi %0, %10 : i32
      %12 = arith.index_cast %11 : i32 to index
      %13 = memref.load %arg1[%12] : memref<16xi32, #tpu.memory_space<smem>>
      %c0_i32_14 = arith.constant 0 : i32
      %14 = tpu.memref_slice %arg2[%13, %c0_i32_14] : memref<64x128xf32, #tpu.memory_space<any>> -> memref<1x128xf32, #tpu.memory_space<any>>
      %c0_i32_15 = arith.constant 0 : i32
      %15 = tpu.memref_slice %arg6[%10, %c0_i32_15] : memref<16x128xf32, #tpu.memory_space<vmem>> -> memref<1x128xf32, #tpu.memory_space<vmem>>
      tpu.enqueue_dma source(%14 : memref<1x128xf32, #tpu.memory_space<any>>) target(%15 : memref<1x128xf32, #tpu.memory_space<vmem>>) target_semaphore(%arg7 : memref<!tpu.dma_semaphore, #tpu.memory_space<semaphore_mem>>)
    }
    %c16_i32_1 = arith.constant 16 : i32
    %c0_i32_2 = arith.constant 0 : i32
    %c16_i32_3 = arith.constant 16 : i32
    %2 = arith.addi %c0_i32_2, %c16_i32_3 : i32
    %c1_i32_4 = arith.constant 1 : i32
    scf.for %arg8 = %c0_i32_2 to %2 step %c1_i32_4  : i32 {
      %c0_i32_12 = arith.constant 0 : i32
      %c0_i32_13 = arith.constant 0 : i32
      %9 = tpu.memref_slice %arg2[%c0_i32_12, %c0_i32_13] : memref<64x128xf32, #tpu.memory_space<any>> -> memref<1x128xf32, #tpu.memory_space<any>>
      %c0_i32_14 = arith.constant 0 : i32
      %c0_i32_15 = arith.constant 0 : i32
      %10 = tpu.memref_slice %arg6[%c0_i32_14, %c0_i32_15] : memref<16x128xf32, #tpu.memory_space<vmem>> -> memref<1x128xf32, #tpu.memory_space<vmem>>
      tpu.wait_dma2 semaphore(%arg7 : memref<!tpu.dma_semaphore, #tpu.memory_space<semaphore_mem>>) src(%9 : memref<1x128xf32, #tpu.memory_space<any>>) dst(%10 : memref<1x128xf32, #tpu.memory_space<vmem>>)
    }
    %c0 = arith.constant 0 : index
    %c0_5 = arith.constant 0 : index
    %3 = vector.load %arg6[%c0, %c0_5] : memref<16x128xf32, #tpu.memory_space<vmem>>, vector<16x128xf32>
    %c0_6 = arith.constant 0 : index
    %c0_7 = arith.constant 0 : index
    %4 = vector.load %arg3[%c0_6, %c0_7] : memref<128x128xf32, #tpu.memory_space<vmem>>, vector<128x128xf32>
    %cst = arith.constant dense<0.000000e+00> : vector<16x128xf32>
    %5 = tpu.matmul %3, %4, %cst {dimension_numbers = #tpu.dot_dimension_numbers<[1], [0], [0], [1], [0, 0, 1, 1], [], []>} : vector<16x128xf32>, vector<128x128xf32>, vector<16x128xf32> -> vector<16x128xf32>
    %c0_8 = arith.constant 0 : index
    %c0_9 = arith.constant 0 : index
    %6 = vector.load %arg4[%c0_8, %c0_9] : memref<16x128xf32, #tpu.memory_space<vmem>>, vector<16x128xf32>
    %7 = arith.addf %5, %6 : vector<16x128xf32>
    %c0_10 = arith.constant 0 : index
    %c0_11 = arith.constant 0 : index
    %8 = vector.load %arg5[%c0_10, %c0_11] : memref<16x128xf32, #tpu.memory_space<vmem>>, vector<16x128xf32>
    tpu.vector_store %arg5[%c0_10, %c0_11], %7 {strides = array<i32>} : memref<16x128xf32, #tpu.memory_space<vmem>>, vector<16x128xf32>,
    return
  }
  func.func @transform_1(%arg0: i32, %arg1: memref<16xi32, #tpu.memory_space<smem>>) -> (i32, i32) {
    %c0_i32 = arith.constant 0 : i32
    %c0_i32_0 = arith.constant 0 : i32
    %c0_i32_1 = arith.constant 0 : i32
    return %c0_i32, %c0_i32_0 : i32, i32
  }
  func.func @transform_2(%arg0: i32, %arg1: memref<16xi32, #tpu.memory_space<smem>>) -> (i32, i32) {
    %c0_i32 = arith.constant 0 : i32
    %c0_i32_0 = arith.constant 0 : i32
    return %arg0, %c0_i32 : i32, i32
  }
  func.func @transform_3(%arg0: i32, %arg1: memref<16xi32, #tpu.memory_space<smem>>) -> (i32, i32) {
    %c0_i32 = arith.constant 0 : i32
    %c0_i32_0 = arith.constant 0 : i32
    return %arg0, %c0_i32 : i32, i32
  }
}

</mosaic_0001>

<bundles_post_ra>
// kernel: tpu_custom_call.1
= control target key start
LH: loop header
LB: loop body
LE: loop exit
PB: predicated region body
PF: predicated region fallthrough
CT: control target
= control target key end

     0   :  { %s343_s18 = smov [#allocation5]   ;;  %s415_s0 = inlined_call_operand.hbm [shape: s32[16], index: 0, kind: input, shape index: {}]   ;;  %s416_s1 = inlined_call_operand.hbm [shape: f32[64,128], index: 1, kind: input, shape index: {}]   ;;  %s417_s2 = inlined_call_operand.hbm [shape: f32[128,128], index: 2, kind: input, shape index: {}]   ;;  %s418_s3 = inlined_call_operand.hbm [shape: f32[16,128], index: 3, kind: input, shape index: {}]   ;;  %s419_s4 = inlined_call_operand.hbm [shape: f32[16,128], index: 4, kind: output, shape index: {}]  }
   0x1   :  { %s10_s17 = sshll.u32 %s415_s0, 4  ;;  %s11_s17 = int_to_ptr.hbm [resolvable:$true] %s10_s17 }
   0x2   :  { %13 = dma.hbm_to_smem %s11_s17, 16, %s343_s18, [#allocation4] }
   0x3   :  { %325 = dma.done.wait [#allocation4], 16 }
   0x4   :  { %326 = vsyncadd [#allocation4], 4294967280 }
   0x5   :  { %16 = sfence }
   0x6   :  { %17 = vsyncpa [#allocation7], 0 }
   0x7   :  { %18 = vsyncpa [#allocation10], 0 }
   0x8   :  { %19 = vsyncpa [#allocation8], 0  ;;  %s24_s21 = sshll.u32 %s417_s2, 4  ;;  %s344_s22 = smov [#allocation6]   ;;  %s25_s21 = int_to_ptr.hbm [resolvable:$true] %s24_s21 }
   0x9   :  { %s26_s23 = sshll.u32 %s344_s22, 4  ;;  %s37_s0 = sshll.u32 %s418_s3, 4  ;;  %s27_s23 = int_to_ptr.vmem [resolvable:$true] %s26_s23  ;;  %s38_s0 = int_to_ptr.hbm [resolvable:$true] %s37_s0 }
   0xa   :  { %s345_s26 = smov 128   ;;  %s346_s27 = smov 8  }
   0xb   :  { %32 = dma.hbm_to_vmem [thread:$0]  %s25_s21, 2048, %s27_s23, [#allocation7], %s345_s26, %s345_s26, %s346_s27  }
   0xc   :  { %s347_s28 = smov [#allocation9]  }
   0xd   :  { %s39_s29 = sshll.u32 %s347_s28, 4  ;;  %s40_s29 = int_to_ptr.vmem [resolvable:$true] %s39_s29 }
   0xe   :  { %45 = dma.hbm_to_vmem [thread:$0]  %s38_s0, 256, %s40_s29, [#allocation10], %s345_s26, %s345_s26, %s346_s27  }
   0xf   :  { %327 = dma.done.wait [#allocation7], 2048  }
  0x10   :  { %328 = vsyncadd [#allocation7], 4294965248 }
  0x11   :  { %329 = dma.done.wait [#allocation10], 256  }
  0x12   :  { %330 = vsyncadd [#allocation10], 4294967040  ;;  %s390_s2 = smov 0  }
  0x13 LB: > { %s62_s3 = sld [smem:[#allocation5 + %s337_s2]]  ;;  %s64_s30 = scalar_lea.vmem [#allocation2], %s337_s2  ;;  %s337_s2 = sphi %s390_s2, %s60_s2  }
  0x14   : > { %s74_s5 = sshll.u32 %s64_s30, 4  ;;  %s273_s14 = scalar_lea.hbm %s416_s1, 64  ;;  %s75_s5 = int_to_ptr.vmem [resolvable:$true] %s74_s5 }
  0x19   : > { %s63_s8 = scalar_lea.hbm %s416_s1, %s62_s3 }
  0x1a   : > { %s72_s9 = sshll.u32 %s63_s8, 4  ;;  %s73_s9 = int_to_ptr.hbm [resolvable:$true] %s72_s9 }
  0x1b   : > { %s269_s10 = sshra.s32 %s73_s9, 4  ;;  %s270_s10 = int_to_ptr.hbm [resolvable:$true] %s269_s10 }
  0x1c   : > { %s271_s11 = scalar_lea.hbm %s270_s10, 1  ;;  %p274_p1 = scmp.lt.s32.totalorder %s270_s10, %s416_s1 }
  0x1d   : > { %p272_p0 = scmp.ne.s32.totalorder %s270_s10, %s271_s11  ;;  %p275_p2 = scmp.lt.s32.totalorder %s273_s14, %s271_s11 }
  0x1f   : > { %p276_p3 = por %p275_p2, %p274_p1 }
  0x21   : > { %p277_p4 = pnand %p276_p3, %p272_p0 }
  0x23   : > { %280 = shalt.err (!%p277_p4)  }
  0x24   : > { %s281_s17 = sshra.s32 %s75_s5, 4  ;;  %s348_s19 = smov [#allocation2]   ;;  %s282_s17 = int_to_ptr.vmem [resolvable:$true] %s281_s17 }
  0x25   : > { %s283_s18 = scalar_lea.vmem %s282_s17, 1  ;;  %s285_s20 = scalar_lea.vmem %s348_s19, 16 }
  0x26   : > { %p284_p5 = scmp.ne.s32.totalorder %s282_s17, %s283_s18  ;;  %p286_p6 = scmp.lt.s32.totalorder %s282_s17, [#allocation2] }
  0x27   : > { %p287_p7 = scmp.lt.s32.totalorder %s285_s20, %s283_s18 }
  0x29   : > { %p288_p8 = por %p287_p7, %p286_p6 }
  0x2b   : > { %p289_p9 = pnand %p288_p8, %p284_p5 }
  0x2d   : > { %292 = shalt.err (!%p289_p9)  }
  0x2e   : > { %77 = dma.hbm_to_vmem [thread:$0]  %s73_s9, 16, %s75_s5, [#allocation3] }
  0x2f   : > { %s60_s2 = sadd.s32 1, %s337_s2  }
  0x30   : > { %p57_p10 = scmp.ge.s32.totalorder %s60_s2, 16  }
  0x31   :  { %s339_s21 = smov (%p57_p10), 0  }
  0x32   :  { %59 = sbr.rel (!%p57_p10) target bundleno = 19 (0x13), region = 56 }
  0x37 LB: > { %331 = dma.done.wait [#allocation3], 16  ;;  %s341_s21 = sphi %s339_s21, %s83_s21  }
  0x38   : > { %332 = vsyncadd [#allocation3], 4294967280  ;;  %s83_s21 = sadd.s32 1, %s341_s21  }
  0x39   : > { %p80_p11 = scmp.ge.s32.totalorder %s83_s21, 16  }
  0x3a   :  { %v104_v0 = vld [vmem:[#allocation6 + $0x78] sm:$0xff] (%p80_p11)  ;;  %v103_v1 = vld [vmem:[#allocation6 + $0x70] sm:$0xff] (%p80_p11)  ;;  %v102_v2 = vld [vmem:[#allocation6 + $0x68] sm:$0xff] (%p80_p11)  ;;  %s349_s1 = smov (%p80_p11), [#allocation11]   ;;  %s138_s25 = sshll.u32 (%p80_p11), %s419_s4, 4  ;;  %s139_s25 = int_to_ptr.hbm [resolvable:$true] %s138_s25 }
  0x3b   :  { %82 = sbr.rel (!%p80_p11) target bundleno = 55 (0x37), region = 67  ;;  %107 = vmatpush.msra.mxu0 (%p80_p11), %v104_v0  ;;  %171 = vmatpush.msra.mxu1 (%p80_p11), %v104_v0  ;;  %v101_v3 = vld [vmem:[#allocation6 + $0x60] sm:$0xff] (%p80_p11)  ;;  %v100_v4 = vld [vmem:[#allocation6 + $0x58] sm:$0xff] (%p80_p11)  ;;  %v99_v5 = vld [vmem:[#allocation6 + $0x50] sm:$0xff] (%p80_p11)  ;;  %s136_s22 = sshll.u32 (%p80_p11), %s349_s1, 4  ;;  %s137_s22 = int_to_ptr.vmem [resolvable:$true] %s136_s22 }
  0x3c   :  { %v98_v6 = vld [vmem:[#allocation6 + $0x48] sm:$0xff] (%p80_p11)  ;;  %v97_v7 = vld [vmem:[#allocation6 + $0x40] sm:$0xff] (%p80_p11)  ;;  %v96_v8 = vld [vmem:[#allocation6 + $0x38] sm:$0xff] (%p80_p11) }
  0x3d   :  { %108 = vmatpush.msra.mxu0 (%p80_p11), %v103_v1  ;;  %172 = vmatpush.msra.mxu1 (%p80_p11), %v103_v1  ;;  %v95_v9 = vld [vmem:[#allocation6 + $0x30] sm:$0xff] (%p80_p11)  ;;  %v94_v10 = vld [vmem:[#allocation6 + $0x28] sm:$0xff] (%p80_p11)  ;;  %v93_v11 = vld [vmem:[#allocation6 + $0x20] sm:$0xff] (%p80_p11) }
  0x3e   :  { %v92_v12 = vld [vmem:[#allocation6 + $0x18] sm:$0xff] (%p80_p11)  ;;  %v91_v13 = vld [vmem:[#allocation6 + $0x10] sm:$0xff] (%p80_p11)  ;;  %v90_v14 = vld [vmem:[#allocation6 + $0x8] sm:$0xff] (%p80_p11) }
  0x3f   :  { %109 = vmatpush.msra.mxu0 (%p80_p11), %v102_v2  ;;  %173 = vmatpush.msra.mxu1 (%p80_p11), %v102_v2  ;;  %v89_v15 = vld [vmem:[#allocation6] sm:$0xff] (%p80_p11)  ;;  %v87_v16 = vld [vmem:[#allocation2] sm:$0xff] (%p80_p11)  ;;  %v88_v17 = vld [vmem:[#allocation2 + $0x8] sm:$0xff] (%p80_p11) }
  0x40   :  { %v105_v18 = vld [vmem:[#allocation9] sm:$0xff]  ;;  %v106_v19 = vld [vmem:[#allocation9 + $0x8] sm:$0xff] }
  0x41   :  { %110 = vmatpush.msra.mxu0 %v101_v3  ;;  %174 = vmatpush.msra.mxu1 %v101_v3 }
  0x43   :  { %111 = vmatpush.msra.mxu0 %v100_v4  ;;  %175 = vmatpush.msra.mxu1 %v100_v4 }
  0x45   :  { %112 = vmatpush.msra.mxu0 %v99_v5  ;;  %176 = vmatpush.msra.mxu1 %v99_v5 }
  0x47   :  { %113 = vmatpush.msra.mxu0 %v98_v6  ;;  %177 = vmatpush.msra.mxu1 %v98_v6 }
  0x49   :  { %114 = vmatpush.msra.mxu0 %v97_v7  ;;  %178 = vmatpush.msra.mxu1 %v97_v7 }
  0x4b   :  { %115 = vmatpush.msra.mxu0 %v96_v8  ;;  %179 = vmatpush.msra.mxu1 %v96_v8 }
  0x4d   :  { %116 = vmatpush.msra.mxu0 %v95_v9  ;;  %180 = vmatpush.msra.mxu1 %v95_v9 }
  0x4f   :  { %117 = vmatpush.msra.mxu0 %v94_v10  ;;  %181 = vmatpush.msra.mxu1 %v94_v10 }
  0x51   :  { %118 = vmatpush.msra.mxu0 %v93_v11  ;;  %182 = vmatpush.msra.mxu1 %v93_v11 }
  0x53   :  { %119 = vmatpush.msra.mxu0 %v92_v12  ;;  %183 = vmatpush.msra.mxu1 %v92_v12 }
  0x55   :  { %120 = vmatpush.msra.mxu0 %v91_v13  ;;  %184 = vmatpush.msra.mxu1 %v91_v13 }
  0x57   :  { %121 = vmatpush.msra.mxu0 %v90_v14  ;;  %185 = vmatpush.msra.mxu1 %v90_v14 }
  0x59   :  { %122 = vmatpush.msra.mxu0 %v89_v15  ;;  %186 = vmatpush.msra.mxu1 %v89_v15 }
  0x5a   :  { %123 = vmatmul.f32.vlgmr.msra.gmra.mxu0 %v87_v16  ;;  %126 = vmatmul.f32.vlgmr.msra.gmra.mxu1 %v88_v17 }
  0xd7   :  { %v124_v20 = vpop.f32.mrf.mxu0  ;;  %v127_v21 = vpop.f32.mrf.mxu1 }
  0xd8   :  { %v125_v22 = vadd.f32 %v124_v20, %v105_v18  ;;  %v128_v23 = vadd.f32 %v127_v21, %v106_v19 }
  0xda   :  { %130 = vst [vmem:[#allocation11] sm:$0xff] %v125_v22 }
  0xdb   :  { %131 = vst [vmem:[#allocation11 + $0x8] sm:$0xff] %v128_v23 }
  0xdc   :  { %144 = dma.vmem_to_hbm [thread:$0]  %s137_s22, 256, %s139_s25, [#allocation8], %s345_s26, %s345_s26, %s346_s27  }
  0xdd   :  { %333 = dma.done.wait [#allocation8], 256  }
  0xde   :  { %334 = vsyncadd [#allocation8], 4294967040 }
  0xdf   :  { %149 = vsyncpa [#allocation7], 1 }
  0xe0   :  { %150 = vsyncpa [#allocation10], 1 }
  0xe1   :  { %151 = vsyncpa [#allocation8], 1 }
  0xe2   :  { %152 = vsyncmov [#allocation3] }
  0xe5   :  { %s153_s0 = vpop.sfrf %152 }
  0xe6   :  { %p170_p12 = scmp.ne.s32.totalorder %s153_s0, 0 }
  0xe8   :  { %157 = shalt.err (%p170_p12)  }

</bundles_post_ra>
